<compile_context>
chip_gen: v7x
topology: tpu7x:2x2x1
jax: 0.10.0
libtpu: 0.0.40
codegen_flags: <defaults>
</compile_context>

<pallas_src>
import functools
import math

import jax
import jax.numpy as jnp
from jax.experimental import pallas as pl
from jax.experimental.pallas import tpu as pltpu


def _round_up(x, m):
    return ((x + m - 1) // m) * m


# ---------------------------------------------------------------------------
# Kernel body: one batch tile of Linear->ReLU->Linear->ReLU->Linear->Tanh.
# ---------------------------------------------------------------------------
def mlp_actor_kernel(obs_ref,
                     w1_ref, b1_ref,
                     w2_ref, b2_ref,
                     w3_ref, b3_ref,
                     out_ref,
                     *, act_limit):
    cd = w1_ref.dtype                       # MXU compute dtype (bf16 by default)
    x = obs_ref[...].astype(cd)             # obs arrives f32; cast in-kernel

    # Layer 1: Linear + ReLU (f32 accumulate / epilogue)
    h = jnp.dot(x, w1_ref[...], preferred_element_type=jnp.float32) + b1_ref[...]
    h = jnp.maximum(h, 0.0)

    # Layer 2: Linear + ReLU
    h = jnp.dot(h.astype(cd), w2_ref[...],
                preferred_element_type=jnp.float32) + b2_ref[...]
    h = jnp.maximum(h, 0.0)

    # Output layer: Linear + Tanh, then act_limit scale
    o = jnp.dot(h.astype(cd), w3_ref[...],
                preferred_element_type=jnp.float32) + b3_ref[...]
    out_ref[...] = (act_limit * jnp.tanh(o)).astype(out_ref.dtype)


# ---------------------------------------------------------------------------
# One-time parameter prep (hoisted out of the per-call path).
# ---------------------------------------------------------------------------
def pack_mlp_actor_params(params, compute_dtype=jnp.bfloat16):
    """Pad hidden/output feature dims to 128 lanes, cast weights to the MXU
    compute dtype, keep biases f32.  obs_dim (layer-1 K) is left unpadded."""
    w1, b1 = params["w1"], params["b1"]
    w2, b2 = params["w2"], params["b2"]
    w3, b3 = params["w3"], params["b3"]

    obs_dim = w1.shape[0]
    h1_dim, h2_dim, act_dim = w1.shape[1], w2.shape[1], w3.shape[1]
    h1_p = _round_up(h1_dim, 128)
    h2_p = _round_up(h2_dim, 128)
    a_p = _round_up(act_dim, 128)

    def pad2(a, rows, cols, dtype):
        a = jnp.asarray(a).reshape(-1, a.shape[-1]) if a.ndim == 2 else jnp.asarray(a).reshape(1, -1)
        return jnp.pad(a, ((0, rows - a.shape[0]),
                           (0, cols - a.shape[1]))).astype(dtype)

    return {
        "w1": pad2(w1, obs_dim, h1_p, compute_dtype),   # K (obs_dim) not padded
        "b1": pad2(b1, 1, h1_p, jnp.float32),
        "w2": pad2(w2, h1_p, h2_p, compute_dtype),
        "b2": pad2(b2, 1, h2_p, jnp.float32),
        "w3": pad2(w3, h2_p, a_p, compute_dtype),
        "b3": pad2(b3, 1, a_p, jnp.float32),
        "obs_dim": obs_dim,
        "act_dim": act_dim,
        "padded_dims": (obs_dim, h1_p, h2_p, a_p),
    }


def _select_batch_tiling(B, block_b, tile_cap):
    """Balanced batch tiling: padded batch stays close to round_up(B, 8)."""
    b8 = _round_up(max(B, 1), 8)
    if block_b is not None:
        tb = _round_up(block_b, 8)          # enforce (8,128) sublane rule
        n_tiles = pl.cdiv(b8, tb)
    else:
        n_tiles = pl.cdiv(b8, tile_cap)
        tb = _round_up(pl.cdiv(b8, n_tiles), 8)
    return tb, n_tiles, tb * n_tiles


def _vmem_limit_bytes(tb, obs_dim, h1_p, h2_p, a_p, compute_dtype, out_dtype):
    """Explicit, generation-aware VMEM budget (asserts it fits)."""
    w_item = jnp.dtype(compute_dtype).itemsize
    o_item = jnp.dtype(out_dtype).itemsize
    w_bytes = (obs_dim * h1_p + h1_p * h2_p + h2_p * a_p) * w_item   # single-buffered
    b_bytes = (h1_p + h2_p + a_p) * 4
    io_bytes = 2 * tb * obs_dim * 4 + 2 * tb * a_p * o_item          # double-buffered obs/out
    scratch = 4 * tb * max(h1_p, h2_p, a_p) * 4                      # f32 intermediates headroom
    need = w_bytes + b_bytes + io_bytes + scratch

    try:
        physical = int(pltpu.get_tpu_info().vmem_capacity_bytes)      # 128 MiB v5e/v6e, 64 MiB v7x
    except Exception:
        physical = 64 * 1024 * 1024                                   # conservative (v7x per-core)
    usable = physical - 8 * 1024 * 1024                               # compiler scratch headroom

    assert need <= usable, (
        f"MLPActor VMEM budget {need} B exceeds usable VMEM {usable} B; "
        f"reduce block_b / tile_cap or hidden sizes.")
    return min(max(int(1.25 * need), 8 * 1024 * 1024), usable)


# ---------------------------------------------------------------------------
# Forward wrapper.
# ---------------------------------------------------------------------------
def mlp_actor_forward(obs, packed, act_limit=1.0, *, block_b=None, tile_cap=512):
    """Run the fused MLPActor forward via a single batch-tiled pallas_call.

    obs:    [B, obs_dim] float32
    packed: output of pack_mlp_actor_params() (pre-padded, bf16 weights).
    """
    B, obs_dim = obs.shape
    assert obs_dim == packed["obs_dim"], "obs feature dim mismatch with packed params"
    _, h1_p, h2_p, a_p = packed["padded_dims"]
    act_dim = packed["act_dim"]
    out_dtype = jnp.float32

    tb, n_tiles, b_p = _select_batch_tiling(B, block_b, tile_cap)
    vmem_limit = _vmem_limit_bytes(tb, obs_dim, h1_p, h2_p, a_p,
                                   packed["w1"].dtype, out_dtype)

    # Only per-call data prep: pad the batch dim if needed (obs stays f32;
    # the bf16 cast happens in-kernel, avoiding an extra XLA op + HBM copy).
    obs_p = obs if b_p == B else jnp.pad(obs, ((0, b_p - B), (0, 0)))

    tile_map = lambda i: (i, 0)     # batch-tiled arrays (obs / out)
    const_map = lambda i: (0, 0)    # weights/biases: resident across the grid

    kernel = functools.partial(mlp_actor_kernel, act_limit=float(act_limit))
    const_shapes = ((obs_dim, h1_p), (1, h1_p),
                    (h1_p, h2_p), (1, h2_p),
                    (h2_p, a_p), (1, a_p))

    def run(single_buffer_weights):
        if single_buffer_weights:
            cspec = lambda s: pl.BlockSpec(s, const_map, pipeline_mode=pl.Buffered(1))
        else:
            cspec = lambda s: pl.BlockSpec(s, const_map)
        return pl.pallas_call(
            kernel,
            out_shape=jax.ShapeDtypeStruct((b_p, a_p), out_dtype),
            grid=(n_tiles,),
            in_specs=[pl.BlockSpec((tb, obs_dim), tile_map)]
                     + [cspec(s) for s in const_shapes],
            out_specs=pl.BlockSpec((tb, a_p), tile_map),
            compiler_params=pltpu.CompilerParams(
                dimension_semantics=("parallel",),
                vmem_limit_bytes=vmem_limit,
            ),
        )(obs_p, packed["w1"], packed["b1"], packed["w2"], packed["b2"],
          packed["w3"], packed["b3"])

    try:
        out_p = run(single_buffer_weights=True)
    except Exception:
        # pipeline_mode=pl.Buffered(1) not supported by this jax/libtpu combo;
        # fall back to default double-buffering of the resident weights.
        out_p = run(single_buffer_weights=False)

    return out_p[:B, :act_dim]


# ---------------------------------------------------------------------------
# Init + pure-JAX reference (matches the PyTorch mlp() initializer / forward).
# ---------------------------------------------------------------------------
def init_mlp_actor_params(key, obs_dim, hidden_sizes, act_dim):
    """xavier_normal_ weights (gain=1) and zero biases; weights stored [in, out]."""
    sizes = [obs_dim] + list(hidden_sizes) + [act_dim]
    params = {}
    keys = jax.random.split(key, len(sizes) - 1)
    for j in range(len(sizes) - 1):
        fan_in, fan_out = sizes[j], sizes[j + 1]
        std = math.sqrt(2.0 / (fan_in + fan_out))  # xavier normal, gain=1
        w = std * jax.random.normal(keys[j], (fan_in, fan_out), dtype=jnp.float32)
        b = jnp.zeros((1, fan_out), dtype=jnp.float32)
        params[f"w{j + 1}"] = w
        params[f"b{j + 1}"] = b
    return params


def mlp_actor_reference(obs, params, act_limit=1.0, compute_dtype=jnp.float32):
    """Pure-JAX reference; compute_dtype mirrors the kernel's matmul precision."""
    def lin(x, w, b):
        return jnp.dot(x.astype(compute_dtype), w.astype(compute_dtype),
                       preferred_element_type=jnp.float32) + b
    h = jnp.maximum(lin(obs, params["w1"], params["b1"]), 0.0)
    h = jnp.maximum(lin(h, params["w2"], params["b2"]), 0.0)
    return act_limit * jnp.tanh(lin(h, params["w3"], params["b3"]))


if __name__ == "__main__":
    # Shapes consistent with the module: obs_dim=16, hidden=(32,32), act_dim=8.
    obs_dim, act_dim = 16, 8
    hidden_sizes = (32, 32)
    act_limit = 2.0

    key = jax.random.PRNGKey(0)
    k_obs_small, k_obs_large, k_params = jax.random.split(key, 3)
    params = init_mlp_actor_params(k_params, obs_dim, hidden_sizes, act_dim)
    packed = pack_mlp_actor_params(params)   # one-time prep, hoisted out of the call path

    # --- small batch (B=2): single grid step, padded to 8 rows only ---
    obs_small = jax.random.normal(k_obs_small, (2, obs_dim), dtype=jnp.float32)
    out_small = jax.block_until_ready(
        mlp_actor_forward(obs_small, packed, act_limit=act_limit))
    ref_bf16 = mlp_actor_reference(obs_small, params, act_limit=act_limit,
                                   compute_dtype=jnp.bfloat16)
    ref_f32 = mlp_actor_reference(obs_small, params, act_limit=act_limit,
                                  compute_dtype=jnp.float32)
    assert out_small.shape == (2, act_dim)
    assert jnp.allclose(out_small, ref_bf16, atol=3e-3, rtol=3e-3), \
        "mismatch vs bf16 reference (small batch)"
    assert jnp.allclose(out_small, ref_f32, atol=3e-2, rtol=3e-2), \
        "mismatch vs f32 reference (small batch)"

    # --- larger batch (B=300): balanced tiling pads to 304 rows (was 512) ---
    obs_large = jax.random.normal(k_obs_large, (300, obs_dim), dtype=jnp.float32)
    out_large = jax.block_until_ready(
        mlp_actor_forward(obs_large, packed, act_limit=act_limit))
    ref_large = mlp_actor_reference(obs_large, params, act_limit=act_limit,
                                    compute_dtype=jnp.bfloat16)
    assert out_large.shape == (300, act_dim)
    assert jnp.allclose(out_large, ref_large, atol=3e-3, rtol=3e-3), \
        "mismatch vs bf16 reference (large batch)"

    # --- explicit multi-tile path (exercises grid > 1 / v7x core sharding) ---
    out_tiled = jax.block_until_ready(
        mlp_actor_forward(obs_large, packed, act_limit=act_limit, block_b=152))
    assert jnp.allclose(out_tiled, ref_large, atol=3e-3, rtol=3e-3), \
        "mismatch vs bf16 reference (multi-tile)"

    print("KERNEL_OK")
</pallas_src>

<mosaic_0001>
module attributes {stable_mosaic.version = 11 : i64} {
  func.func @mlp_actor_kernel(%arg0: i32, %arg1: memref<8x16xf32, #tpu.memory_space<vmem>>, %arg2: memref<16x128xbf16, #tpu.memory_space<vmem>>, %arg3: memref<1x128xf32, #tpu.memory_space<vmem>>, %arg4: memref<128x128xbf16, #tpu.memory_space<vmem>>, %arg5: memref<1x128xf32, #tpu.memory_space<vmem>>, %arg6: memref<128x128xbf16, #tpu.memory_space<vmem>>, %arg7: memref<1x128xf32, #tpu.memory_space<vmem>>, %arg8: memref<8x128xf32, #tpu.memory_space<vmem>>) attributes {dimension_semantics = [#tpu.dimension_semantics<parallel>], iteration_bounds = array<i64: 1>, scalar_prefetch = 0 : i64, scratch_operands = 0 : i64, tpu.core_type = #tpu.core_type<tc>, window_params = [{transform_indices = @transform_0, window_bounds = array<i64: 8, 16>}, {pipeline_mode = #tpu.pipeline_mode<synchronous>, transform_indices = @transform_1, window_bounds = array<i64: 16, 128>}, {pipeline_mode = #tpu.pipeline_mode<synchronous>, transform_indices = @transform_2, window_bounds = array<i64: 1, 128>}, {pipeline_mode = #tpu.pipeline_mode<synchronous>, transform_indices = @transform_3, window_bounds = array<i64: 128, 128>}, {pipeline_mode = #tpu.pipeline_mode<synchronous>, transform_indices = @transform_4, window_bounds = array<i64: 1, 128>}, {pipeline_mode = #tpu.pipeline_mode<synchronous>, transform_indices = @transform_5, window_bounds = array<i64: 128, 128>}, {pipeline_mode = #tpu.pipeline_mode<synchronous>, transform_indices = @transform_6, window_bounds = array<i64: 1, 128>}, {transform_indices = @transform_7, window_bounds = array<i64: 8, 128>}]} {
    %c0 = arith.constant 0 : index
    %c0_0 = arith.constant 0 : index
    %0 = vector.load %arg1[%c0, %c0_0] : memref<8x16xf32, #tpu.memory_space<vmem>>, vector<8x16xf32>
    %1 = arith.truncf %0 : vector<8x16xf32> to vector<8x16xbf16>
    %c0_1 = arith.constant 0 : index
    %c0_2 = arith.constant 0 : index
    %2 = vector.load %arg2[%c0_1, %c0_2] : memref<16x128xbf16, #tpu.memory_space<vmem>>, vector<16x128xbf16>
    %cst = arith.constant dense<0.000000e+00> : vector<8x128xf32>
    %3 = tpu.matmul %1, %2, %cst {dimension_numbers = #tpu.dot_dimension_numbers<[1], [0], [0], [1], [0, 0, 1, 1], [], []>} : vector<8x16xbf16>, vector<16x128xbf16>, vector<8x128xf32> -> vector<8x128xf32>
    %c0_3 = arith.constant 0 : index
    %c0_4 = arith.constant 0 : index
    %4 = vector.load %arg3[%c0_3, %c0_4] : memref<1x128xf32, #tpu.memory_space<vmem>>, vector<1x128xf32>
    %5 = vector.broadcast %4 : vector<1x128xf32> to vector<8x128xf32>
    %6 = arith.addf %3, %5 : vector<8x128xf32>
    %cst_5 = arith.constant 0.000000e+00 : f32
    %7 = vector.broadcast %cst_5 : f32 to vector<8x128xf32>
    %8 = arith.maximumf %6, %7 : vector<8x128xf32>
    %9 = arith.truncf %8 : vector<8x128xf32> to vector<8x128xbf16>
    %c0_6 = arith.constant 0 : index
    %c0_7 = arith.constant 0 : index
    %10 = vector.load %arg4[%c0_6, %c0_7] : memref<128x128xbf16, #tpu.memory_space<vmem>>, vector<128x128xbf16>
    %cst_8 = arith.constant dense<0.000000e+00> : vector<8x128xf32>
    %11 = tpu.matmul %9, %10, %cst_8 {dimension_numbers = #tpu.dot_dimension_numbers<[1], [0], [0], [1], [0, 0, 1, 1], [], []>} : vector<8x128xbf16>, vector<128x128xbf16>, vector<8x128xf32> -> vector<8x128xf32>
    %c0_9 = arith.constant 0 : index
    %c0_10 = arith.constant 0 : index
    %12 = vector.load %arg5[%c0_9, %c0_10] : memref<1x128xf32, #tpu.memory_space<vmem>>, vector<1x128xf32>
    %13 = vector.broadcast %12 : vector<1x128xf32> to vector<8x128xf32>
    %14 = arith.addf %11, %13 : vector<8x128xf32>
    %cst_11 = arith.constant 0.000000e+00 : f32
    %15 = vector.broadcast %cst_11 : f32 to vector<8x128xf32>
    %16 = arith.maximumf %14, %15 : vector<8x128xf32>
    %17 = arith.truncf %16 : vector<8x128xf32> to vector<8x128xbf16>
    %c0_12 = arith.constant 0 : index
    %c0_13 = arith.constant 0 : index
    %18 = vector.load %arg6[%c0_12, %c0_13] : memref<128x128xbf16, #tpu.memory_space<vmem>>, vector<128x128xbf16>
    %cst_14 = arith.constant dense<0.000000e+00> : vector<8x128xf32>
    %19 = tpu.matmul %17, %18, %cst_14 {dimension_numbers = #tpu.dot_dimension_numbers<[1], [0], [0], [1], [0, 0, 1, 1], [], []>} : vector<8x128xbf16>, vector<128x128xbf16>, vector<8x128xf32> -> vector<8x128xf32>
    %c0_15 = arith.constant 0 : index
    %c0_16 = arith.constant 0 : index
    %20 = vector.load %arg7[%c0_15, %c0_16] : memref<1x128xf32, #tpu.memory_space<vmem>>, vector<1x128xf32>
    %21 = vector.broadcast %20 : vector<1x128xf32> to vector<8x128xf32>
    %22 = arith.addf %19, %21 : vector<8x128xf32>
    %23 = math.tanh %22 : vector<8x128xf32>
    %cst_17 = arith.constant 2.000000e+00 : f32
    %24 = vector.broadcast %cst_17 : f32 to vector<8x128xf32>
    %25 = arith.mulf %24, %23 : vector<8x128xf32>
    %c0_18 = arith.constant 0 : index
    %c0_19 = arith.constant 0 : index
    %26 = vector.load %arg8[%c0_18, %c0_19] : memref<8x128xf32, #tpu.memory_space<vmem>>, vector<8x128xf32>
    tpu.vector_store %arg8[%c0_18, %c0_19], %25 {strides = array<i32>} : memref<8x128xf32, #tpu.memory_space<vmem>>, vector<8x128xf32>,
    return
  }
  func.func @transform_0(%arg0: i32) -> (i32, i32) {
    %c0_i32 = arith.constant 0 : i32
    %c0_i32_0 = arith.constant 0 : i32
    return %arg0, %c0_i32 : i32, i32
  }
  func.func @transform_1(%arg0: i32) -> (i32, i32) {
    %c0_i32 = arith.constant 0 : i32
    %c0_i32_0 = arith.constant 0 : i32
    %c0_i32_1 = arith.constant 0 : i32
    return %c0_i32, %c0_i32_0 : i32, i32
  }
  func.func @transform_2(%arg0: i32) -> (i32, i32) {
    %c0_i32 = arith.constant 0 : i32
    %c0_i32_0 = arith.constant 0 : i32
    %c0_i32_1 = arith.constant 0 : i32
    return %c0_i32, %c0_i32_0 : i32, i32
  }
  func.func @transform_3(%arg0: i32) -> (i32, i32) {
    %c0_i32 = arith.constant 0 : i32
    %c0_i32_0 = arith.constant 0 : i32
    %c0_i32_1 = arith.constant 0 : i32
    return %c0_i32, %c0_i32_0 : i32, i32
  }
  func.func @transform_4(%arg0: i32) -> (i32, i32) {
    %c0_i32 = arith.constant 0 : i32
    %c0_i32_0 = arith.constant 0 : i32
    %c0_i32_1 = arith.constant 0 : i32
    return %c0_i32, %c0_i32_0 : i32, i32
  }
  func.func @transform_5(%arg0: i32) -> (i32, i32) {
    %c0_i32 = arith.constant 0 : i32
    %c0_i32_0 = arith.constant 0 : i32
    %c0_i32_1 = arith.constant 0 : i32
    return %c0_i32, %c0_i32_0 : i32, i32
  }
  func.func @transform_6(%arg0: i32) -> (i32, i32) {
    %c0_i32 = arith.constant 0 : i32
    %c0_i32_0 = arith.constant 0 : i32
    %c0_i32_1 = arith.constant 0 : i32
    return %c0_i32, %c0_i32_0 : i32, i32
  }
  func.func @transform_7(%arg0: i32) -> (i32, i32) {
    %c0_i32 = arith.constant 0 : i32
    %c0_i32_0 = arith.constant 0 : i32
    return %arg0, %c0_i32 : i32, i32
  }
}

module attributes {stable_mosaic.version = 11 : i64} {
  func.func @mlp_actor_kernel(%arg0: i32, %arg1: memref<8x16xf32, #tpu.memory_space<vmem>>, %arg2: memref<16x128xbf16, #tpu.memory_space<vmem>>, %arg3: memref<1x128xf32, #tpu.memory_space<vmem>>, %arg4: memref<128x128xbf16, #tpu.memory_space<vmem>>, %arg5: memref<1x128xf32, #tpu.memory_space<vmem>>, %arg6: memref<128x128xbf16, #tpu.memory_space<vmem>>, %arg7: memref<1x128xf32, #tpu.memory_space<vmem>>, %arg8: memref<8x128xf32, #tpu.memory_space<vmem>>) attributes {dimension_semantics = [#tpu.dimension_semantics<parallel>], iteration_bounds = array<i64: 1>, scalar_prefetch = 0 : i64, scratch_operands = 0 : i64, tpu.core_type = #tpu.core_type<tc>, window_params = [{transform_indices = @transform_0, window_bounds = array<i64: 8, 16>}, {pipeline_mode = #tpu.pipeline_mode<synchronous>, transform_indices = @transform_1, window_bounds = array<i64: 16, 128>}, {pipeline_mode = #tpu.pipeline_mode<synchronous>, transform_indices = @transform_2, window_bounds = array<i64: 1, 128>}, {pipeline_mode = #tpu.pipeline_mode<synchronous>, transform_indices = @transform_3, window_bounds = array<i64: 128, 128>}, {pipeline_mode = #tpu.pipeline_mode<synchronous>, transform_indices = @transform_4, window_bounds = array<i64: 1, 128>}, {pipeline_mode = #tpu.pipeline_mode<synchronous>, transform_indices = @transform_5, window_bounds = array<i64: 128, 128>}, {pipeline_mode = #tpu.pipeline_mode<synchronous>, transform_indices = @transform_6, window_bounds = array<i64: 1, 128>}, {transform_indices = @transform_7, window_bounds = array<i64: 8, 128>}]} {
    %c0 = arith.constant 0 : index
    %c0_0 = arith.constant 0 : index
    %0 = vector.load %arg1[%c0, %c0_0] : memref<8x16xf32, #tpu.memory_space<vmem>>, vector<8x16xf32>
    %1 = arith.truncf %0 : vector<8x16xf32> to vector<8x16xbf16>
    %c0_1 = arith.constant 0 : index
    %c0_2 = arith.constant 0 : index
    %2 = vector.load %arg2[%c0_1, %c0_2] : memref<16x128xbf16, #tpu.memory_space<vmem>>, vector<16x128xbf16>
    %cst = arith.constant dense<0.000000e+00> : vector<8x128xf32>
    %3 = tpu.matmul %1, %2, %cst {dimension_numbers = #tpu.dot_dimension_numbers<[1], [0], [0], [1], [0, 0, 1, 1], [], []>} : vector<8x16xbf16>, vector<16x128xbf16>, vector<8x128xf32> -> vector<8x128xf32>
    %c0_3 = arith.constant 0 : index
    %c0_4 = arith.constant 0 : index
    %4 = vector.load %arg3[%c0_3, %c0_4] : memref<1x128xf32, #tpu.memory_space<vmem>>, vector<1x128xf32>
    %5 = vector.broadcast %4 : vector<1x128xf32> to vector<8x128xf32>
    %6 = arith.addf %3, %5 : vector<8x128xf32>
    %cst_5 = arith.constant 0.000000e+00 : f32
    %7 = vector.broadcast %cst_5 : f32 to vector<8x128xf32>
    %8 = arith.maximumf %6, %7 : vector<8x128xf32>
    %9 = arith.truncf %8 : vector<8x128xf32> to vector<8x128xbf16>
    %c0_6 = arith.constant 0 : index
    %c0_7 = arith.constant 0 : index
    %10 = vector.load %arg4[%c0_6, %c0_7] : memref<128x128xbf16, #tpu.memory_space<vmem>>, vector<128x128xbf16>
    %cst_8 = arith.constant dense<0.000000e+00> : vector<8x128xf32>
    %11 = tpu.matmul %9, %10, %cst_8 {dimension_numbers = #tpu.dot_dimension_numbers<[1], [0], [0], [1], [0, 0, 1, 1], [], []>} : vector<8x128xbf16>, vector<128x128xbf16>, vector<8x128xf32> -> vector<8x128xf32>
    %c0_9 = arith.constant 0 : index
    %c0_10 = arith.constant 0 : index
    %12 = vector.load %arg5[%c0_9, %c0_10] : memref<1x128xf32, #tpu.memory_space<vmem>>, vector<1x128xf32>
    %13 = vector.broadcast %12 : vector<1x128xf32> to vector<8x128xf32>
    %14 = arith.addf %11, %13 : vector<8x128xf32>
    %cst_11 = arith.constant 0.000000e+00 : f32
    %15 = vector.broadcast %cst_11 : f32 to vector<8x128xf32>
    %16 = arith.maximumf %14, %15 : vector<8x128xf32>
    %17 = arith.truncf %16 : vector<8x128xf32> to vector<8x128xbf16>
    %c0_12 = arith.constant 0 : index
    %c0_13 = arith.constant 0 : index
    %18 = vector.load %arg6[%c0_12, %c0_13] : memref<128x128xbf16, #tpu.memory_space<vmem>>, vector<128x128xbf16>
    %cst_14 = arith.constant dense<0.000000e+00> : vector<8x128xf32>
    %19 = tpu.matmul %17, %18, %cst_14 {dimension_numbers = #tpu.dot_dimension_numbers<[1], [0], [0], [1], [0, 0, 1, 1], [], []>} : vector<8x128xbf16>, vector<128x128xbf16>, vector<8x128xf32> -> vector<8x128xf32>
    %c0_15 = arith.constant 0 : index
    %c0_16 = arith.constant 0 : index
    %20 = vector.load %arg7[%c0_15, %c0_16] : memref<1x128xf32, #tpu.memory_space<vmem>>, vector<1x128xf32>
    %21 = vector.broadcast %20 : vector<1x128xf32> to vector<8x128xf32>
    %22 = arith.addf %19, %21 : vector<8x128xf32>
    %23 = math.tanh %22 : vector<8x128xf32>
    %cst_17 = arith.constant 2.000000e+00 : f32
    %24 = vector.broadcast %cst_17 : f32 to vector<8x128xf32>
    %25 = arith.mulf %24, %23 : vector<8x128xf32>
    %c0_18 = arith.constant 0 : index
    %c0_19 = arith.constant 0 : index
    %26 = vector.load %arg8[%c0_18, %c0_19] : memref<8x128xf32, #tpu.memory_space<vmem>>, vector<8x128xf32>
    tpu.vector_store %arg8[%c0_18, %c0_19], %25 {strides = array<i32>} : memref<8x128xf32, #tpu.memory_space<vmem>>, vector<8x128xf32>,
    return
  }
  func.func @transform_0(%arg0: i32) -> (i32, i32) {
    %c0_i32 = arith.constant 0 : i32
    %c0_i32_0 = arith.constant 0 : i32
    return %arg0, %c0_i32 : i32, i32
  }
  func.func @transform_1(%arg0: i32) -> (i32, i32) {
    %c0_i32 = arith.constant 0 : i32
    %c0_i32_0 = arith.constant 0 : i32
    %c0_i32_1 = arith.constant 0 : i32
    return %c0_i32, %c0_i32_0 : i32, i32
  }
  func.func @transform_2(%arg0: i32) -> (i32, i32) {
    %c0_i32 = arith.constant 0 : i32
    %c0_i32_0 = arith.constant 0 : i32
    %c0_i32_1 = arith.constant 0 : i32
    return %c0_i32, %c0_i32_0 : i32, i32
  }
  func.func @transform_3(%arg0: i32) -> (i32, i32) {
    %c0_i32 = arith.constant 0 : i32
    %c0_i32_0 = arith.constant 0 : i32
    %c0_i32_1 = arith.constant 0 : i32
    return %c0_i32, %c0_i32_0 : i32, i32
  }
  func.func @transform_4(%arg0: i32) -> (i32, i32) {
    %c0_i32 = arith.constant 0 : i32
    %c0_i32_0 = arith.constant 0 : i32
    %c0_i32_1 = arith.constant 0 : i32
    return %c0_i32, %c0_i32_0 : i32, i32
  }
  func.func @transform_5(%arg0: i32) -> (i32, i32) {
    %c0_i32 = arith.constant 0 : i32
    %c0_i32_0 = arith.constant 0 : i32
    %c0_i32_1 = arith.constant 0 : i32
    return %c0_i32, %c0_i32_0 : i32, i32
  }
  func.func @transform_6(%arg0: i32) -> (i32, i32) {
    %c0_i32 = arith.constant 0 : i32
    %c0_i32_0 = arith.constant 0 : i32
    %c0_i32_1 = arith.constant 0 : i32
    return %c0_i32, %c0_i32_0 : i32, i32
  }
  func.func @transform_7(%arg0: i32) -> (i32, i32) {
    %c0_i32 = arith.constant 0 : i32
    %c0_i32_0 = arith.constant 0 : i32
    return %arg0, %c0_i32 : i32, i32
  }
}

</mosaic_0001>

<bundles_post_ra>
// kernel: tpu_custom_call.1
= control target key start
LH: loop header
LB: loop body
LE: loop exit
PB: predicated region body
PF: predicated region fallthrough
CT: control target
= control target key end

     0   :  { %12 = vsyncpa [#allocation3], 0  ;;  %s768_s0 = inlined_call_operand.hbm [shape: f32[8,16], index: 0, kind: input, shape index: {}]   ;;  %s769_s1 = inlined_call_operand.hbm [shape: bf16[16,128], index: 1, kind: input, shape index: {}]   ;;  %s770_s2 = inlined_call_operand.vmem [shape: f32[1,128], index: 2, kind: input, shape index: {}]   ;;  %s771_s3 = inlined_call_operand.hbm [shape: bf16[128,128], index: 3, kind: input, shape index: {}]   ;;  %s772_s4 = inlined_call_operand.vmem [shape: f32[1,128], index: 4, kind: input, shape index: {}]   ;;  %s773_s5 = inlined_call_operand.hbm [shape: bf16[128,128], index: 5, kind: input, shape index: {}]   ;;  %s774_s6 = inlined_call_operand.vmem [shape: f32[1,128], index: 6, kind: input, shape index: {}]   ;;  %s775_s7 = inlined_call_operand.hbm [shape: f32[8,128], index: 7, kind: output, shape index: {}]  }
   0x1   :  { %13 = vsyncpa [#allocation6], 0 }
   0x2   :  { %14 = vsyncpa [#allocation9], 0 }
   0x3   :  { %15 = vsyncpa [#allocation4], 0  ;;  %s621_s24 = smov [#allocation5]   ;;  %s503_s28 = scalar_lea.hbm %s769_s1, 128 }
   0x4   :  { %s31_s25 = sshll.u32 %s621_s24, 4  ;;  %p504_p0 = scmp.ne.s32.totalorder %s769_s1, %s503_s28  ;;  %s32_s25 = int_to_ptr.vmem [resolvable:$true] %s31_s25 }
   0x5   :  { %p507_p1 = scmp.lt.u32.totalorder %s503_s28, %s769_s1 }
   0x7   :  { %p509_p2 = pnand %p507_p1, %p504_p0 }
   0x9   :  { %512 = shalt.err (!%p509_p2)
}
   0xa   :  { %s513_s10 = scalar_lea.vmem %s32_s25, 128  ;;  %p518_p4 = scmp.lt.s32.totalorder %s32_s25, %s32_s25 }
   0xb   :  { %p514_p3 = scmp.ne.s32.totalorder %s32_s25, %s513_s10  ;;  %p519_p5 = scmp.lt.s32.totalorder %s513_s10, %s513_s10 }
   0xd   :  { %p520_p6 = por %p519_p5, %p518_p4 }
   0xf   :  { %p521_p7 = pnand %p520_p6, %p514_p3 }
  0x11   :  { %524 = shalt.err (!%p521_p7)
}
  0x12   :  { %s622_s11 = smov 64   ;;  %s623_s12 = smov 4  }
  0x13   :  { %37 = dma.hbm_to_vmem [thread:$0]  %s769_s1, 128, %s32_s25, [#allocation6], %s622_s11, %s622_s11, %s623_s12  }
  0x14   :  { %s624_s15 = smov [#allocation2]   ;;  %s625_s17 = smov [#allocation7]  }
  0x15   :  { %s22_s16 = sshll.u32 %s624_s15, 4  ;;  %s45_s18 = sshll.u32 %s625_s17, 4  ;;  %s23_s16 = int_to_ptr.vmem [resolvable:$true] %s22_s16  ;;  %s46_s18 = int_to_ptr.vmem [resolvable:$true] %s45_s18 }
  0x16   :  { %s525_s21 = scalar_lea.hbm %s768_s0, 128 }
  0x17   :  { %p526_p8 = scmp.ne.s32.totalorder %s768_s0, %s525_s21  ;;  %p529_p9 = scmp.lt.u32.totalorder %s525_s21, %s768_s0 }
  0x19   :  { %p531_p10 = pnand %p529_p9, %p526_p8 }
  0x1b   :  { %534 = shalt.err (!%p531_p10)
}
  0x1c   :  { %s535_s1 = scalar_lea.vmem %s23_s16, 128  ;;  %p540_p12 = scmp.lt.s32.totalorder %s23_s16, %s23_s16 }
  0x1d   :  { %p536_p11 = scmp.ne.s32.totalorder %s23_s16, %s535_s1  ;;  %p541_p13 = scmp.lt.s32.totalorder %s535_s1, %s535_s1 }
  0x1f   :  { %p542_p0 = por %p541_p13, %p540_p12 }
  0x21   :  { %p543_p1 = pnand %p542_p0, %p536_p11 }
  0x23   :  { %546 = shalt.err (!%p543_p1)
}
  0x24   :  { %25 = dma.hbm_to_vmem [thread:$0]  %s768_s0, 128, %s23_s16, [#allocation3]  }
  0x25   :  { %s547_s30 = scalar_lea.hbm %s771_s3, 1024 }
  0x26   :  { %p548_p2 = scmp.ne.s32.totalorder %s771_s3, %s547_s30  ;;  %p551_p3 = scmp.lt.u32.totalorder %s547_s30, %s771_s3 }
  0x28   :  { %p553_p4 = pnand %p551_p3, %p548_p2 }
  0x2a   :  { %556 = shalt.err (!%p553_p4)
}
  0x2b   :  { %s557_s14 = scalar_lea.vmem %s46_s18, 1024  ;;  %p562_p6 = scmp.lt.s32.totalorder %s46_s18, %s46_s18 }
  0x2c   :  { %p558_p5 = scmp.ne.s32.totalorder %s46_s18, %s557_s14  ;;  %p563_p7 = scmp.lt.s32.totalorder %s557_s14, %s557_s14 }
  0x2e   :  { %p564_p8 = por %p563_p7, %p562_p6 }
  0x30   :  { %p565_p9 = pnand %p564_p8, %p558_p5 }
  0x32   :  { %568 = shalt.err (!%p565_p9)
}
  0x33   :  { %51 = dma.hbm_to_vmem [thread:$0]  %s771_s3, 1024, %s46_s18, [#allocation6], %s622_s11, %s622_s11, %s623_s12  }
  0x34   :  { %s626_s16 = smov [#allocation8]   ;;  %s569_s21 = scalar_lea.hbm %s773_s5, 1024 }
  0x35   :  { %s59_s17 = sshll.u32 %s626_s16, 4  ;;  %p570_p10 = scmp.ne.s32.totalorder %s773_s5, %s569_s21  ;;  %s60_s17 = int_to_ptr.vmem [resolvable:$true] %s59_s17 }
  0x36   :  { %p573_p11 = scmp.lt.u32.totalorder %s569_s21, %s773_s5 }
  0x38   :  { %p575_p12 = pnand %p573_p11, %p570_p10 }
  0x3a   :  { %578 = shalt.err (!%p575_p12)
}
  0x3b   :  { %s579_s1 = scalar_lea.vmem %s60_s17, 1024  ;;  %p584_p0 = scmp.lt.s32.totalorder %s60_s17, %s60_s17 }
  0x3c   :  { %p580_p13 = scmp.ne.s32.totalorder %s60_s17, %s579_s1  ;;  %p585_p1 = scmp.lt.s32.totalorder %s579_s1, %s579_s1 }
  0x3e   :  { %p586_p2 = por %p585_p1, %p584_p0 }
  0x40   :  { %p587_p3 = pnand %p586_p2, %p580_p13 }
  0x42   :  { %590 = shalt.err (!%p587_p3)
}
  0x43   :  { %65 = dma.hbm_to_vmem [thread:$0]  %s773_s5, 1024, %s60_s17, [#allocation9], %s622_s11, %s622_s11, %s623_s12  }
  0x44   :  { %613 = dma.done.wait [#allocation3], 128  }
  0x45   :  { %614 = vsyncadd [#allocation3], 4294967168 }
  0x46   :  { %615 = dma.done.wait [#allocation6], 1152  }
  0x47   :  { %616 = vsyncadd [#allocation6], 4294966144 }
  0x48   :  { %617 = dma.done.wait [#allocation9], 1024  }
  0x49   :  { %618 = vsyncadd [#allocation9], 4294966272  ;;  %v627_v0 = vmov 0.0   ;;  %vm628_vm0 = vmmov 0   ;;  %v484_v1 = vld [vmem:[#allocation5] sm:$0xff]   ;;  %v81_v2 = vld [vmem:[#allocation2] sm:$0xff] }
  0x4a   :  { %429 = vmatprep.subr.bf16.mxu0 %v627_v0  ;;  %431 = vmatprep.mubr.msk.bf16.mxu0 %vm628_vm0, %v627_v0  ;;  %v82_v3 = vpack.c.bf16 %v81_v2, %v81_v2  ;;  %vm98_vm1 = vcmask 130048   ;;  %v485_v4 = vld [vmem:[#allocation7] sm:$0xff]   ;;  %v486_v5 = vld [vmem:[#allocation7 + $0x8] sm:$0xff]   ;;  %v487_v6 = vld [vmem:[#allocation7 + $0x10] sm:$0xff]   ;;  %s629_s28 = smov [#allocation10]  }
  0x4b   :  { %435 = vmatprep.subr.bf16.mxu1 %v627_v0  ;;  %451 = vmatprep.mubr.msk.bf16.mxu1 %vm628_vm0, %v627_v0  ;;  %v488_v7 = vld [vmem:[#allocation7 + $0x18] sm:$0xff]   ;;  %v489_v8 = vld [vmem:[#allocation7 + $0x20] sm:$0xff]   ;;  %v490_v9 = vld [vmem:[#allocation7 + $0x28] sm:$0xff]  }
  0x4c   :  { %430 = vmatpush3.bf16.msra.mxu0 %v484_v1  ;;  %436 = vmatpush3.bf16.msra.mxu1 %v485_v4  ;;  %v491_v10 = vld [vmem:[#allocation7 + $0x30] sm:$0xff]   ;;  %v492_v11 = vld [vmem:[#allocation7 + $0x38] sm:$0xff]   ;;  %v493_v12 = vld [vmem:[#allocation8] sm:$0xff]  }
  0x4d   :  { %455 = vmatprep.subr.bf16.mxu0 %v627_v0  ;;  %437 = vmatprep.subr.bf16.mxu1 %v627_v0  ;;  %v494_v13 = vld [vmem:[#allocation8 + $0x8] sm:$0xff]   ;;  %v495_v14 = vld [vmem:[#allocation8 + $0x10] sm:$0xff]   ;;  %v496_v15 = vld [vmem:[#allocation8 + $0x18] sm:$0xff]  }
  0x4e   :  { %v497_v16 = vld [vmem:[#allocation8 + $0x20] sm:$0xff]   ;;  %v498_v17 = vld [vmem:[#allocation8 + $0x28] sm:$0xff]   ;;  %v388_v18 = vld [vmem:[%s770_s2] ss:$0 sm:$0xff] }
  0x4f   :  { %432 = vmatmul.mubr.msk.bf16.vlgmr.msra.gmra.mrb[0].mxu0 %vm98_vm1, %v82_v3  ;;  %v499_v26 = vld [vmem:[#allocation8 + $0x30] sm:$0xff]   ;;  %v500_v27 = vld [vmem:[#allocation8 + $0x38] sm:$0xff]  }
  0x50   :  { %471 = vmatprep.mubr.msk.bf16.mxu0 %vm628_vm0, %v627_v0  ;;  %438 = vmatpush3.bf16.msra.mxu1 %v486_v5  ;;  %v391_v28 = vld [vmem:[%s772_s4] ss:$0 sm:$0xff]  ;;  %s377_s4 = sshll.u32 %s629_s28, 4  ;;  %s378_s4 = int_to_ptr.vmem [resolvable:$true] %s377_s4 }
  0x51   :  { %439 = vmatprep.subr.bf16.mxu1 %v627_v0  ;;  %456 = vmatpush3.bf16.msra.mxu0 %v493_v12  ;;  %v400_v36 = vld [vmem:[%s774_s6] ss:$0 sm:$0xff]  ;;  %s591_s29 = scalar_lea.vmem %s378_s4, 128  ;;  %p596_p5 = scmp.lt.s32.totalorder %s378_s4, %s378_s4 }
  0x52   :  { %457 = vmatprep.subr.bf16.mxu0 %v627_v0  ;;  %p592_p4 = scmp.ne.s32.totalorder %s378_s4, %s591_s29  ;;  %p597_p6 = scmp.lt.s32.totalorder %s591_s29, %s591_s29 }
  0x54   :  { %440 = vmatpush3.bf16.msra.mxu1 %v487_v6  ;;  %p598_p7 = por %p597_p6, %p596_p5 }
  0x55   :  { %441 = vmatprep.subr.bf16.mxu1 %v627_v0  ;;  %458 = vmatpush3.bf16.msra.mxu0 %v494_v13 }
  0x56   :  { %459 = vmatprep.subr.bf16.mxu0 %v627_v0  ;;  %p599_p8 = pnand %p598_p7, %p592_p4 }
  0x58   :  { %442 = vmatpush3.bf16.msra.mxu1 %v488_v7 }
  0x59   :  { %443 = vmatprep.subr.bf16.mxu1 %v627_v0  ;;  %460 = vmatpush3.bf16.msra.mxu0 %v495_v14 }
  0x5a   :  { %461 = vmatprep.subr.bf16.mxu0 %v627_v0 }
  0x5c   :  { %444 = vmatpush3.bf16.msra.mxu1 %v489_v8 }
  0x5d   :  { %445 = vmatprep.subr.bf16.mxu1 %v627_v0  ;;  %462 = vmatpush3.bf16.msra.mxu0 %v496_v15 }
  0x5e   :  { %463 = vmatprep.subr.bf16.mxu0 %v627_v0 }
  0x60   :  { %446 = vmatpush3.bf16.msra.mxu1 %v490_v9 }
  0x61   :  { %447 = vmatprep.subr.bf16.mxu1 %v627_v0  ;;  %464 = vmatpush3.bf16.msra.mxu0 %v497_v16 }
  0x62   :  { %465 = vmatprep.subr.bf16.mxu0 %v627_v0 }
  0x64   :  { %448 = vmatpush3.bf16.msra.mxu1 %v491_v10 }
  0x65   :  { %449 = vmatprep.subr.bf16.mxu1 %v627_v0  ;;  %466 = vmatpush3.bf16.msra.mxu0 %v498_v17 }
  0x66   :  { %467 = vmatprep.subr.bf16.mxu0 %v627_v0 }
  0x68   :  { %450 = vmatpush3.bf16.msra.mxu1 %v492_v11 }
  0x69   :  { %468 = vmatpush3.bf16.msra.mxu0 %v499_v26 }
  0x6a   :  { %469 = vmatprep.subr.bf16.mxu0 %v627_v0 }
  0x6d   :  { %470 = vmatpush3.bf16.msra.mxu0 %v500_v27 }
 0x122   :  { %v136_v19 = vpop.f32.mrb[0].mxu0 }
 0x123   :  { %v137_v20 = vadd.f32 %v388_v18, %v136_v19  ;;  %v433_v21 = vpop.f32.mrb[1].mxu0 }
 0x124   :  { %v139_v22 = vpop.f32.mrb[2].mxu0 }
 0x125   :  { %v142_v23 = vmax.f32 %v137_v20, 0.0  ;;  %v434_v24 = vpop.f32.mrb[3].mxu0 }
 0x127   :  { %v143_v25 = vpack.c.bf16 %v142_v23, %v142_v23 }
 0x129   :  { %452 = vmatmul.mubr.bf16.vlgmr.msra.gmra.mrb[0].mxu1 %v143_v25 }
 0x1fc   :  { %v249_v29 = vpop.f32.mrb[0].mxu1 }
 0x1fd   :  { %v250_v30 = vadd.f32 %v391_v28, %v249_v29  ;;  %v453_v31 = vpop.f32.mrb[1].mxu1 }
 0x1fe   :  { %v252_v32 = vpop.f32.mrb[2].mxu1 }
 0x1ff   :  { %v255_v33 = vmax.f32 %v250_v30, 0.0  ;;  %v454_v34 = vpop.f32.mrb[3].mxu1 }
 0x201   :  { %v256_v35 = vpack.c.bf16 %v255_v33, %v255_v33 }
 0x203   :  { %472 = vmatmul.mubr.bf16.vlgmr.msra.gmra.mrb[4].mxu0 %v256_v35 }
 0x2d6   :  { %v362_v37 = vpop.f32.mrb[4].mxu0 }
 0x2d7   :  { %v363_v38 = vadd.f32 %v400_v36, %v362_v37  ;;  %v473_v39 = vpop.f32.mrb[5].mxu0 }
 0x2d8   :  { %v365_v40 = vpop.f32.mrb[6].mxu0 }
 0x2d9   :  { %501 = vtanh.f32 %v363_v38  ;;  %v474_v41 = vpop.f32.mrb[7].mxu0 }
 0x2e3   :  { %v502_v42 = vpop.eup %501 }
 0x2e4   :  { %v369_v43 = vmul.f32 2.0, %v502_v42 }
 0x2e6   :  { %370 = vst [vmem:[#allocation10] sm:$0xff] %v369_v43 }
 0x2e7   :  { %602 = shalt.err (!%p599_p8)
}
 0x2e8   :  { %s603_s8 = scalar_lea.hbm %s775_s7, 128 }
 0x2e9   :  { %p604_p9 = scmp.ne.s32.totalorder %s775_s7, %s603_s8  ;;  %p607_p10 = scmp.lt.u32.totalorder %s603_s8, %s775_s7 }
 0x2eb   :  { %p609_p11 = pnand %p607_p10, %p604_p9 }
 0x2ed   :  { %612 = shalt.err (!%p609_p11)
}
 0x2ee   :  { %380 = dma.vmem_to_hbm [thread:$0]  %s378_s4, 128, %s775_s7, [#allocation4]  }
 0x2ef   :  { %619 = dma.done.wait [#allocation4], 128  }
 0x2f0   :  { %620 = vsyncadd [#allocation4], 4294967168 }
 0x2f1   :  { %384 = vsyncpa [#allocation3], 1 }
 0x2f2   :  { %385 = vsyncpa [#allocation6], 1 }
 0x2f3   :  { %386 = vsyncpa [#allocation9], 1 }
 0x2f4   :  { %387 = vsyncpa [#allocation4], 1 }

// kernel: tpu_custom_call.1
= control target key start
LH: loop header
LB: loop body
LE: loop exit
PB: predicated region body
PF: predicated region fallthrough
CT: control target
= control target key end

     0   :  { %12 = vsyncpa [#allocation3], 0  ;;  %s768_s0 = inlined_call_operand.hbm [shape: f32[8,16], index: 0, kind: input, shape index: {}]   ;;  %s769_s1 = inlined_call_operand.hbm [shape: bf16[16,128], index: 1, kind: input, shape index: {}]   ;;  %s770_s2 = inlined_call_operand.vmem [shape: f32[1,128], index: 2, kind: input, shape index: {}]   ;;  %s771_s3 = inlined_call_operand.hbm [shape: bf16[128,128], index: 3, kind: input, shape index: {}]   ;;  %s772_s4 = inlined_call_operand.vmem [shape: f32[1,128], index: 4, kind: input, shape index: {}]   ;;  %s773_s5 = inlined_call_operand.hbm [shape: bf16[128,128], index: 5, kind: input, shape index: {}]   ;;  %s774_s6 = inlined_call_operand.vmem [shape: f32[1,128], index: 6, kind: input, shape index: {}]   ;;  %s775_s7 = inlined_call_operand.hbm [shape: f32[8,128], index: 7, kind: output, shape index: {}]  }
   0x1   :  { %13 = vsyncpa [#allocation6], 0 }
   0x2   :  { %14 = vsyncpa [#allocation9], 0 }
   0x3   :  { %15 = vsyncpa [#allocation4], 0  ;;  %s621_s24 = smov [#allocation5]   ;;  %s503_s28 = scalar_lea.hbm %s769_s1, 128 }
   0x4   :  { %s31_s25 = sshll.u32 %s621_s24, 4  ;;  %p504_p0 = scmp.ne.s32.totalorder %s769_s1, %s503_s28  ;;  %s32_s25 = int_to_ptr.vmem [resolvable:$true] %s31_s25 }
   0x5   :  { %p507_p1 = scmp.lt.u32.totalorder %s503_s28, %s769_s1 }
   0x7   :  { %p509_p2 = pnand %p507_p1, %p504_p0 }
   0x9   :  { %512 = shalt.err (!%p509_p2)
}
   0xa   :  { %s513_s10 = scalar_lea.vmem %s32_s25, 128  ;;  %p518_p4 = scmp.lt.s32.totalorder %s32_s25, %s32_s25 }
   0xb   :  { %p514_p3 = scmp.ne.s32.totalorder %s32_s25, %s513_s10  ;;  %p519_p5 = scmp.lt.s32.totalorder %s513_s10, %s513_s10 }
   0xd   :  { %p520_p6 = por %p519_p5, %p518_p4 }
   0xf   :  { %p521_p7 = pnand %p520_p6, %p514_p3 }
  0x11   :  { %524 = shalt.err (!%p521_p7)
}
  0x12   :  { %s622_s11 = smov 64   ;;  %s623_s12 = smov 4  }
  0x13   :  { %37 = dma.hbm_to_vmem [thread:$0]  %s769_s1, 128, %s32_s25, [#allocation6], %s622_s11, %s622_s11, %s623_s12  }
  0x14   :  { %s624_s15 = smov [#allocation2]   ;;  %s625_s17 = smov [#allocation7]  }
  0x15   :  { %s22_s16 = sshll.u32 %s624_s15, 4  ;;  %s45_s18 = sshll.u32 %s625_s17, 4  ;;  %s23_s16 = int_to_ptr.vmem [resolvable:$true] %s22_s16  ;;  %s46_s18 = int_to_ptr.vmem [resolvable:$true] %s45_s18 }
  0x16   :  { %s525_s21 = scalar_lea.hbm %s768_s0, 128 }
  0x17   :  { %p526_p8 = scmp.ne.s32.totalorder %s768_s0, %s525_s21  ;;  %p529_p9 = scmp.lt.u32.totalorder %s525_s21, %s768_s0 }
  0x19   :  { %p531_p10 = pnand %p529_p9, %p526_p8 }
  0x1b   :  { %534 = shalt.err (!%p531_p10)
}
  0x1c   :  { %s535_s1 = scalar_lea.vmem %s23_s16, 128  ;;  %p540_p12 = scmp.lt.s32.totalorder %s23_s16, %s23_s16 }
  0x1d   :  { %p536_p11 = scmp.ne.s32.totalorder %s23_s16, %s535_s1  ;;  %p541_p13 = scmp.lt.s32.totalorder %s535_s1, %s535_s1 }
  0x1f   :  { %p542_p0 = por %p541_p13, %p540_p12 }
  0x21   :  { %p543_p1 = pnand %p542_p0, %p536_p11 }
  0x23   :  { %546 = shalt.err (!%p543_p1)
}
  0x24   :  { %25 = dma.hbm_to_vmem [thread:$0]  %s768_s0, 128, %s23_s16, [#allocation3]  }
  0x25   :  { %s547_s30 = scalar_lea.hbm %s771_s3, 1024 }
  0x26   :  { %p548_p2 = scmp.ne.s32.totalorder %s771_s3, %s547_s30  ;;  %p551_p3 = scmp.lt.u32.totalorder %s547_s30, %s771_s3 }
  0x28   :  { %p553_p4 = pnand %p551_p3, %p548_p2 }
  0x2a   :  { %556 = shalt.err (!%p553_p4)
}
  0x2b   :  { %s557_s14 = scalar_lea.vmem %s46_s18, 1024  ;;  %p562_p6 = scmp.lt.s32.totalorder %s46_s18, %s46_s18 }
  0x2c   :  { %p558_p5 = scmp.ne.s32.totalorder %s46_s18, %s557_s14  ;;  %p563_p7 = scmp.lt.s32.totalorder %s557_s14, %s557_s14 }
  0x2e   :  { %p564_p8 = por %p563_p7, %p562_p6 }
  0x30   :  { %p565_p9 = pnand %p564_p8, %p558_p5 }
  0x32   :  { %568 = shalt.err (!%p565_p9)
}
  0x33   :  { %51 = dma.hbm_to_vmem [thread:$0]  %s771_s3, 1024, %s46_s18, [#allocation6], %s622_s11, %s622_s11, %s623_s12  }
  0x34   :  { %s626_s16 = smov [#allocation8]   ;;  %s569_s21 = scalar_lea.hbm %s773_s5, 1024 }
  0x35   :  { %s59_s17 = sshll.u32 %s626_s16, 4  ;;  %p570_p10 = scmp.ne.s32.totalorder %s773_s5, %s569_s21  ;;  %s60_s17 = int_to_ptr.vmem [resolvable:$true] %s59_s17 }
  0x36   :  { %p573_p11 = scmp.lt.u32.totalorder %s569_s21, %s773_s5 }
  0x38   :  { %p575_p12 = pnand %p573_p11, %p570_p10 }
  0x3a   :  { %578 = shalt.err (!%p575_p12)
}
  0x3b   :  { %s579_s1 = scalar_lea.vmem %s60_s17, 1024  ;;  %p584_p0 = scmp.lt.s32.totalorder %s60_s17, %s60_s17 }
  0x3c   :  { %p580_p13 = scmp.ne.s32.totalorder %s60_s17, %s579_s1  ;;  %p585_p1 = scmp.lt.s32.totalorder %s579_s1, %s579_s1 }
  0x3e   :  { %p586_p2 = por %p585_p1, %p584_p0 }
  0x40   :  { %p587_p3 = pnand %p586_p2, %p580_p13 }
  0x42   :  { %590 = shalt.err (!%p587_p3)
}
  0x43   :  { %65 = dma.hbm_to_vmem [thread:$0]  %s773_s5, 1024, %s60_s17, [#allocation9], %s622_s11, %s622_s11, %s623_s12  }
  0x44   :  { %613 = dma.done.wait [#allocation3], 128  }
  0x45   :  { %614 = vsyncadd [#allocation3], 4294967168 }
  0x46   :  { %615 = dma.done.wait [#allocation6], 1152  }
  0x47   :  { %616 = vsyncadd [#allocation6], 4294966144 }
  0x48   :  { %617 = dma.done.wait [#allocation9], 1024  }
  0x49   :  { %618 = vsyncadd [#allocation9], 4294966272  ;;  %v627_v0 = vmov 0.0   ;;  %vm628_vm0 = vmmov 0   ;;  %v484_v1 = vld [vmem:[#allocation5] sm:$0xff]   ;;  %v81_v2 = vld [vmem:[#allocation2] sm:$0xff] }
  0x4a   :  { %429 = vmatprep.subr.bf16.mxu0 %v627_v0  ;;  %431 = vmatprep.mubr.msk.bf16.mxu0 %vm628_vm0, %v627_v0  ;;  %v82_v3 = vpack.c.bf16 %v81_v2, %v81_v2  ;;  %vm98_vm1 = vcmask 130048   ;;  %v485_v4 = vld [vmem:[#allocation7] sm:$0xff]   ;;  %v486_v5 = vld [vmem:[#allocation7 + $0x8] sm:$0xff]   ;;  %v487_v6 = vld [vmem:[#allocation7 + $0x10] sm:$0xff]   ;;  %s629_s28 = smov [#allocation10]  }
  0x4b   :  { %435 = vmatprep.subr.bf16.mxu1 %v627_v0  ;;  %451 = vmatprep.mubr.msk.bf16.mxu1 %vm628_vm0, %v627_v0  ;;  %v488_v7 = vld [vmem:[#allocation7 + $0x18] sm:$0xff]   ;;  %v489_v8 = vld [vmem:[#allocation7 + $0x20] sm:$0xff]   ;;  %v490_v9 = vld [vmem:[#allocation7 + $0x28] sm:$0xff]  }
  0x4c   :  { %430 = vmatpush3.bf16.msra.mxu0 %v484_v1  ;;  %436 = vmatpush3.bf16.msra.mxu1 %v485_v4  ;;  %v491_v10 = vld [vmem:[#allocation7 + $0x30] sm:$0xff]   ;;  %v492_v11 = vld [vmem:[#allocation7 + $0x38] sm:$0xff]   ;;  %v493_v12 = vld [vmem:[#allocation8] sm:$0xff]  }
  0x4d   :  { %455 = vmatprep.subr.bf16.mxu0 %v627_v0  ;;  %437 = vmatprep.subr.bf16.mxu1 %v627_v0  ;;  %v494_v13 = vld [vmem:[#allocation8 + $0x8] sm:$0xff]   ;;  %v495_v14 = vld [vmem:[#allocation8 + $0x10] sm:$0xff]   ;;  %v496_v15 = vld [vmem:[#allocation8 + $0x18] sm:$0xff]  }
  0x4e   :  { %v497_v16 = vld [vmem:[#allocation8 + $0x20] sm:$0xff]   ;;  %v498_v17 = vld [vmem:[#allocation8 + $0x28] sm:$0xff]   ;;  %v388_v18 = vld [vmem:[%s770_s2] ss:$0 sm:$0xff] }
  0x4f   :  { %432 = vmatmul.mubr.msk.bf16.vlgmr.msra.gmra.mrb[0].mxu0 %vm98_vm1, %v82_v3  ;;  %v499_v26 = vld [vmem:[#allocation8 + $0x30] sm:$0xff]   ;;  %v500_v27 = vld [vmem:[#allocation8 + $0x38] sm:$0xff]  }
  0x50   :  { %471 = vmatprep.mubr.msk.bf16.mxu0 %vm628_vm0, %v627_v0  ;;  %438 = vmatpush3.bf16.msra.mxu1 %v486_v5  ;;  %v391_v28 = vld [vmem:[%s772_s4] ss:$0 sm:$0xff]  ;;  %s377_s4 = sshll.u32 %s629_s28, 4  ;;  %s378_s4 = int_to_ptr.vmem [resolvable:$true] %s377_s4 }
  0x51   :  { %439 = vmatprep.subr.bf16.mxu1 %v627_v0  ;;  %456 = vmatpush3.bf16.msra.mxu0 %v493_v12  ;;  %v400_v36 = vld [vmem:[%s774_s6] ss:$0 sm:$0xff]  ;;  %s591_s29 = scalar_lea.vmem %s378_s4, 128  ;;  %p596_p5 = scmp.lt.s32.totalorder %s378_s4, %s378_s4 }
  0x52   :  { %457 = vmatprep.subr.bf16.mxu0 %v627_v0  ;;  %p592_p4 = scmp.ne.s32.totalorder %s378_s4, %s591_s29  ;;  %p597_p6 = scmp.lt.s32.totalorder %s591_s29, %s591_s29 }
  0x54   :  { %440 = vmatpush3.bf16.msra.mxu1 %v487_v6  ;;  %p598_p7 = por %p597_p6, %p596_p5 }
  0x55   :  { %441 = vmatprep.subr.bf16.mxu1 %v627_v0  ;;  %458 = vmatpush3.bf16.msra.mxu0 %v494_v13 }
  0x56   :  { %459 = vmatprep.subr.bf16.mxu0 %v627_v0  ;;  %p599_p8 = pnand %p598_p7, %p592_p4 }
  0x58   :  { %442 = vmatpush3.bf16.msra.mxu1 %v488_v7 }
  0x59   :  { %443 = vmatprep.subr.bf16.mxu1 %v627_v0  ;;  %460 = vmatpush3.bf16.msra.mxu0 %v495_v14 }
  0x5a   :  { %461 = vmatprep.subr.bf16.mxu0 %v627_v0 }
  0x5c   :  { %444 = vmatpush3.bf16.msra.mxu1 %v489_v8 }
  0x5d   :  { %445 = vmatprep.subr.bf16.mxu1 %v627_v0  ;;  %462 = vmatpush3.bf16.msra.mxu0 %v496_v15 }
  0x5e   :  { %463 = vmatprep.subr.bf16.mxu0 %v627_v0 }
  0x60   :  { %446 = vmatpush3.bf16.msra.mxu1 %v490_v9 }
  0x61   :  { %447 = vmatprep.subr.bf16.mxu1 %v627_v0  ;;  %464 = vmatpush3.bf16.msra.mxu0 %v497_v16 }
  0x62   :  { %465 = vmatprep.subr.bf16.mxu0 %v627_v0 }
  0x64   :  { %448 = vmatpush3.bf16.msra.mxu1 %v491_v10 }
  0x65   :  { %449 = vmatprep.subr.bf16.mxu1 %v627_v0  ;;  %466 = vmatpush3.bf16.msra.mxu0 %v498_v17 }
  0x66   :  { %467 = vmatprep.subr.bf16.mxu0 %v627_v0 }
  0x68   :  { %450 = vmatpush3.bf16.msra.mxu1 %v492_v11 }
  0x69   :  { %468 = vmatpush3.bf16.msra.mxu0 %v499_v26 }
  0x6a   :  { %469 = vmatprep.subr.bf16.mxu0 %v627_v0 }
  0x6d   :  { %470 = vmatpush3.bf16.msra.mxu0 %v500_v27 }
 0x122   :  { %v136_v19 = vpop.f32.mrb[0].mxu0 }
 0x123   :  { %v137_v20 = vadd.f32 %v388_v18, %v136_v19  ;;  %v433_v21 = vpop.f32.mrb[1].mxu0 }
 0x124   :  { %v139_v22 = vpop.f32.mrb[2].mxu0 }
 0x125   :  { %v142_v23 = vmax.f32 %v137_v20, 0.0  ;;  %v434_v24 = vpop.f32.mrb[3].mxu0 }
 0x127   :  { %v143_v25 = vpack.c.bf16 %v142_v23, %v142_v23 }
 0x129   :  { %452 = vmatmul.mubr.bf16.vlgmr.msra.gmra.mrb[0].mxu1 %v143_v25 }
 0x1fc   :  { %v249_v29 = vpop.f32.mrb[0].mxu1 }
 0x1fd   :  { %v250_v30 = vadd.f32 %v391_v28, %v249_v29  ;;  %v453_v31 = vpop.f32.mrb[1].mxu1 }
 0x1fe   :  { %v252_v32 = vpop.f32.mrb[2].mxu1 }
 0x1ff   :  { %v255_v33 = vmax.f32 %v250_v30, 0.0  ;;  %v454_v34 = vpop.f32.mrb[3].mxu1 }
 0x201   :  { %v256_v35 = vpack.c.bf16 %v255_v33, %v255_v33 }
 0x203   :  { %472 = vmatmul.mubr.bf16.vlgmr.msra.gmra.mrb[4].mxu0 %v256_v35 }
 0x2d6   :  { %v362_v37 = vpop.f32.mrb[4].mxu0 }
 0x2d7   :  { %v363_v38 = vadd.f32 %v400_v36, %v362_v37  ;;  %v473_v39 = vpop.f32.mrb[5].mxu0 }
 0x2d8   :  { %v365_v40 = vpop.f32.mrb[6].mxu0 }
 0x2d9   :  { %501 = vtanh.f32 %v363_v38  ;;  %v474_v41 = vpop.f32.mrb[7].mxu0 }
 0x2e3   :  { %v502_v42 = vpop.eup %501 }
 0x2e4   :  { %v369_v43 = vmul.f32 2.0, %v502_v42 }
 0x2e6   :  { %370 = vst [vmem:[#allocation10] sm:$0xff] %v369_v43 }
 0x2e7   :  { %602 = shalt.err (!%p599_p8)
}
 0x2e8   :  { %s603_s8 = scalar_lea.hbm %s775_s7, 128 }
 0x2e9   :  { %p604_p9 = scmp.ne.s32.totalorder %s775_s7, %s603_s8  ;;  %p607_p10 = scmp.lt.u32.totalorder %s603_s8, %s775_s7 }
 0x2eb   :  { %p609_p11 = pnand %p607_p10, %p604_p9 }
 0x2ed   :  { %612 = shalt.err (!%p609_p11)
}
 0x2ee   :  { %380 = dma.vmem_to_hbm [thread:$0]  %s378_s4, 128, %s775_s7, [#allocation4]  }
 0x2ef   :  { %619 = dma.done.wait [#allocation4], 128  }
 0x2f0   :  { %620 = vsyncadd [#allocation4], 4294967168 }
 0x2f1   :  { %384 = vsyncpa [#allocation3], 1 }
 0x2f2   :  { %385 = vsyncpa [#allocation6], 1 }
 0x2f3   :  { %386 = vsyncpa [#allocation9], 1 }
 0x2f4   :  { %387 = vsyncpa [#allocation4], 1 }

</bundles_post_ra>
